<compile_context>
chip_gen: v5e
topology: v5e:2x2
jax: 0.10.0
libtpu: 0.0.40
codegen_flags: <defaults>
</compile_context>

<pallas_src>
import jax
import jax.numpy as jnp
from jax.experimental import pallas as pl
from jax.experimental.pallas import tpu as pltpu

NEG_SLOPE = 0.01   # nn.LeakyReLU() default
BN_EPS = 1e-5      # nn.BatchNorm1d default


def _round_up(n, m):
    return ((n + m - 1) // m) * m


def _cdiv(a, b):
    return (a + b - 1) // b


# --------------------------------------------------------------------------
# Kernel
# --------------------------------------------------------------------------
def _mlp_kernel(x_ref, w1_ref, b1_ref, w2_ref, b2_ref, o_ref):
    """One batch tile of the fused MLP.

    x_ref  : (TILE_B, in_size)   f32 activations (cast to bf16 in-kernel)
    w1_ref : (in_size, fil_num)  bf16, BN1/BN2 pre-folded
    b1_ref : (1, fil_num)        f32, BN1/BN2 pre-folded
    w2_ref : (fil_num, out)      bf16 (unpadded; out == full array dim)
    b2_ref : (1, out)            f32
    o_ref  : (TILE_B, out)       f32 output tile (narrow, unpadded)
    """
    # fc1 (+ folded bn1/bn2): bf16 MXU matmul, f32 accumulation.
    x = x_ref[...].astype(jnp.bfloat16)
    h = jnp.dot(x, w1_ref[...], preferred_element_type=jnp.float32)
    h = h + b1_ref[...]

    # LeakyReLU (f32 on the VPU)
    h = jnp.where(h > 0, h, NEG_SLOPE * h)

    # fc2: bf16 MXU matmul, f32 accumulation, narrow store (out columns only).
    y = jnp.dot(h.astype(jnp.bfloat16), w2_ref[...],
                preferred_element_type=jnp.float32)
    o_ref[...] = (y + b2_ref[...]).astype(o_ref.dtype)


# --------------------------------------------------------------------------
# One-time parameter preparation (hoisted out of the per-call path)
# --------------------------------------------------------------------------
def prepare_params(params):
    """Fold BatchNorm1d (eval, running stats) into fc1 and cast matmul
    operands to bf16.  Call once when parameters are loaded."""
    inv_std1 = 1.0 / jnp.sqrt(params["bn1_var"] + BN_EPS)
    s1 = params["bn1_gamma"] * inv_std1                       # (in_size,)
    t1 = params["bn1_beta"] - params["bn1_mean"] * s1         # (in_size,)

    inv_std2 = 1.0 / jnp.sqrt(params["bn2_var"] + BN_EPS)
    s2 = params["bn2_gamma"] * inv_std2                       # (fil_num,)
    t2 = params["bn2_beta"] - params["bn2_mean"] * s2         # (fil_num,)

    # BN1 and BN2 folded into fc1's weight / bias:
    #   W1' = s1[:,None] * W1 * s2[None,:],  b1' = (t1 @ W1 + b1) * s2 + t2
    w1f = (s1[:, None] * params["fc1_w"]) * s2[None, :]               # (in, fil)
    b1f = (t1 @ params["fc1_w"] + params["fc1_b"]) * s2 + t2          # (fil,)

    fil_num = w1f.shape[1]
    out = params["fc2_w"].shape[1]
    return {
        "w1": w1f.astype(jnp.bfloat16),                               # (in, fil)
        "b1": b1f.reshape(1, fil_num).astype(jnp.float32),            # (1, fil)
        "w2": params["fc2_w"].astype(jnp.bfloat16),                   # (fil, out)
        "b2": params["fc2_b"].reshape(1, out).astype(jnp.float32),    # (1, out)
    }


# --------------------------------------------------------------------------
# Tiling / wrapper
# --------------------------------------------------------------------------
def _choose_tiling(B, target_rows=512):
    """Pick a batch-tile size: ~target_rows rows for large B, at least two
    tiles for B > 16 (megacore sharding on v7x), minimal last-tile waste."""
    n_tiles = max(1, _cdiv(B, target_rows))
    if n_tiles == 1 and B > 16:
        n_tiles = 2
    tb = _round_up(_cdiv(B, n_tiles), 8)
    n_tiles = _cdiv(B, tb)
    return tb, n_tiles


def mlp_forward(x, prepared, target_rows=512):
    """Run the fused MLP kernel on a batch of (B, in_size) activations."""
    B, in_size = x.shape
    fil_num = prepared["w1"].shape[1]
    out = prepared["w2"].shape[1]

    tb, n_tiles = _choose_tiling(B, target_rows)

    # ---- VMEM budget: weights single-buffered, x/out tiles double-buffered,
    #      generation-aware cap with headroom (v7x has only 64 MiB / TC).
    weight_bytes = (prepared["w1"].size * 2 + prepared["w2"].size * 2
                    + prepared["b1"].size * 4 + prepared["b2"].size * 4)
    tile_bytes = tb * in_size * 4 + tb * out * 4
    need = weight_bytes + 2 * tile_bytes + (2 << 20)
    try:
        phys = pltpu.get_tpu_info().vmem_capacity_bytes
    except Exception:
        phys = 64 << 20
    vmem_limit = int(min(max(need, 16 << 20), int(phys * 3 // 4)))

    resident = dict(pipeline_mode=pl.Buffered(buffer_count=1))

    y = pl.pallas_call(
        _mlp_kernel,
        out_shape=jax.ShapeDtypeStruct((B, out), jnp.float32),
        grid=(n_tiles,),
        in_specs=[
            pl.BlockSpec((tb, in_size), lambda i: (i, 0)),                 # x tile
            pl.BlockSpec((in_size, fil_num), lambda i: (0, 0), **resident),  # W1
            pl.BlockSpec((1, fil_num), lambda i: (0, 0), **resident),        # b1
            pl.BlockSpec((fil_num, out), lambda i: (0, 0), **resident),      # W2
            pl.BlockSpec((1, out), lambda i: (0, 0), **resident),            # b2
        ],
        out_specs=pl.BlockSpec((tb, out), lambda i: (i, 0)),
        compiler_params=pltpu.CompilerParams(
            dimension_semantics=("parallel",),
            vmem_limit_bytes=vmem_limit),
    )(x.astype(jnp.float32), prepared["w1"], prepared["b1"],
      prepared["w2"], prepared["b2"])

    return y


# --------------------------------------------------------------------------
# Parameters / reference
# --------------------------------------------------------------------------
def init_params(key, in_size, fil_num, out=4):
    """Deterministic synthetic parameters matching _MLP's shapes."""
    ks = jax.random.split(key, 10)
    return {
        # BatchNorm1d(in_size)
        "bn1_gamma": jax.random.uniform(ks[0], (in_size,), jnp.float32, 0.5, 1.5),
        "bn1_beta":  jax.random.normal(ks[1], (in_size,), jnp.float32) * 0.1,
        "bn1_mean":  jax.random.normal(ks[2], (in_size,), jnp.float32) * 0.1,
        "bn1_var":   jax.random.uniform(ks[3], (in_size,), jnp.float32, 0.5, 1.5),
        # Linear(in_size, fil_num)  -- stored (in, out) for x @ W
        "fc1_w": jax.random.normal(ks[4], (in_size, fil_num), jnp.float32)
                 * (1.0 / jnp.sqrt(in_size)),
        "fc1_b": jax.random.normal(ks[5], (fil_num,), jnp.float32) * 0.05,
        # BatchNorm1d(fil_num)
        "bn2_gamma": jax.random.uniform(ks[6], (fil_num,), jnp.float32, 0.5, 1.5),
        "bn2_beta":  jax.random.normal(ks[7], (fil_num,), jnp.float32) * 0.1,
        "bn2_mean":  jnp.zeros((fil_num,), jnp.float32),
        "bn2_var":   jnp.ones((fil_num,), jnp.float32),
        # Linear(fil_num, out)
        "fc2_w": jax.random.normal(ks[8], (fil_num, out), jnp.float32)
                 * (1.0 / jnp.sqrt(fil_num)),
        "fc2_b": jax.random.normal(ks[9], (out,), jnp.float32) * 0.05,
    }


def reference_forward(x, params):
    """Pure-JAX f32 reference (matches the PyTorch eval-mode forward)."""
    inv_std1 = 1.0 / jnp.sqrt(params["bn1_var"] + BN_EPS)
    h = (x - params["bn1_mean"]) * inv_std1 * params["bn1_gamma"] + params["bn1_beta"]
    h = h @ params["fc1_w"] + params["fc1_b"]
    inv_std2 = 1.0 / jnp.sqrt(params["bn2_var"] + BN_EPS)
    h = (h - params["bn2_mean"]) * inv_std2 * params["bn2_gamma"] + params["bn2_beta"]
    h = jnp.where(h > 0, h, NEG_SLOPE * h)
    return h @ params["fc2_w"] + params["fc2_b"]


if __name__ == "__main__":
    # Small shapes consistent with the module: in_size=32, fil_num=32, out=4.
    IN_SIZE, FIL_NUM, OUT = 32, 32, 4

    key = jax.random.PRNGKey(0)
    kx1, kx2, kp = jax.random.split(key, 3)
    params = init_params(kp, IN_SIZE, FIL_NUM, OUT)
    prepared = prepare_params(params)          # one-time BN fold + bf16 cast

    # --- case 1: tiny batch (single tile) ---
    B1 = 8
    x1 = jax.random.normal(kx1, (B1, IN_SIZE), jnp.float32)
    y1 = jax.block_until_ready(mlp_forward(x1, prepared))
    y1_ref = reference_forward(x1, params)
    assert y1.shape == (B1, OUT)
    assert jnp.allclose(y1, y1_ref, atol=5e-2, rtol=5e-2), "mismatch (B=8)"

    # --- case 2: ragged multi-tile batch (exercises grid>1 + masked last block)
    B2 = 300
    x2 = jax.random.normal(kx2, (B2, IN_SIZE), jnp.float32)
    y2 = jax.block_until_ready(mlp_forward(x2, prepared))
    y2_ref = reference_forward(x2, params)
    assert y2.shape == (B2, OUT)
    assert jnp.allclose(y2, y2_ref, atol=5e-2, rtol=5e-2), "mismatch (B=300)"

    # TODO(synk): Dropout (training mode) and batch-statistic BatchNorm are not
    # modeled; eval-mode semantics are implemented (dropout = identity).
    print("KERNEL_OK")
</pallas_src>

<mosaic_0001>
module attributes {stable_mosaic.version = 11 : i64} {
  func.func @_mlp_kernel(%arg0: i32, %arg1: memref<8x32xf32, #tpu.memory_space<vmem>>, %arg2: memref<32x32xbf16, #tpu.memory_space<vmem>>, %arg3: memref<1x32xf32, #tpu.memory_space<vmem>>, %arg4: memref<32x4xbf16, #tpu.memory_space<vmem>>, %arg5: memref<1x4xf32, #tpu.memory_space<vmem>>, %arg6: memref<8x4xf32, #tpu.memory_space<vmem>>) attributes {dimension_semantics = [#tpu.dimension_semantics<parallel>], iteration_bounds = array<i64: 1>, scalar_prefetch = 0 : i64, scratch_operands = 0 : i64, tpu.core_type = #tpu.core_type<tc>, window_params = [{transform_indices = @transform_0, window_bounds = array<i64: 8, 32>}, {pipeline_mode = #tpu.pipeline_mode<synchronous>, transform_indices = @transform_1, window_bounds = array<i64: 32, 32>}, {pipeline_mode = #tpu.pipeline_mode<synchronous>, transform_indices = @transform_2, window_bounds = array<i64: 1, 32>}, {pipeline_mode = #tpu.pipeline_mode<synchronous>, transform_indices = @transform_3, window_bounds = array<i64: 32, 4>}, {pipeline_mode = #tpu.pipeline_mode<synchronous>, transform_indices = @transform_4, window_bounds = array<i64: 1, 4>}, {transform_indices = @transform_5, window_bounds = array<i64: 8, 4>}]} {
    %c0 = arith.constant 0 : index
    %c0_0 = arith.constant 0 : index
    %0 = vector.load %arg1[%c0, %c0_0] : memref<8x32xf32, #tpu.memory_space<vmem>>, vector<8x32xf32>
    %1 = arith.truncf %0 : vector<8x32xf32> to vector<8x32xbf16>
    %c0_1 = arith.constant 0 : index
    %c0_2 = arith.constant 0 : index
    %2 = vector.load %arg2[%c0_1, %c0_2] : memref<32x32xbf16, #tpu.memory_space<vmem>>, vector<32x32xbf16>
    %cst = arith.constant dense<0.000000e+00> : vector<8x32xf32>
    %3 = tpu.matmul %1, %2, %cst {dimension_numbers = #tpu.dot_dimension_numbers<[1], [0], [0], [1], [0, 0, 1, 1], [], []>} : vector<8x32xbf16>, vector<32x32xbf16>, vector<8x32xf32> -> vector<8x32xf32>
    %c0_3 = arith.constant 0 : index
    %c0_4 = arith.constant 0 : index
    %4 = vector.load %arg3[%c0_3, %c0_4] : memref<1x32xf32, #tpu.memory_space<vmem>>, vector<1x32xf32>
    %5 = vector.broadcast %4 : vector<1x32xf32> to vector<8x32xf32>
    %6 = arith.addf %3, %5 : vector<8x32xf32>
    %cst_5 = arith.constant 0.000000e+00 : f32
    %7 = vector.broadcast %cst_5 : f32 to vector<8x32xf32>
    %8 = arith.cmpf ogt, %6, %7 : vector<8x32xf32>
    %cst_6 = arith.constant 0.00999999977 : f32
    %9 = vector.broadcast %cst_6 : f32 to vector<8x32xf32>
    %10 = arith.mulf %9, %6 : vector<8x32xf32>
    %11 = arith.select %8, %6, %10 : vector<8x32xi1>, vector<8x32xf32>
    %12 = arith.truncf %11 : vector<8x32xf32> to vector<8x32xbf16>
    %c0_7 = arith.constant 0 : index
    %c0_8 = arith.constant 0 : index
    %13 = vector.load %arg4[%c0_7, %c0_8] : memref<32x4xbf16, #tpu.memory_space<vmem>>, vector<32x4xbf16>
    %cst_9 = arith.constant dense<0.000000e+00> : vector<8x4xf32>
    %14 = tpu.matmul %12, %13, %cst_9 {dimension_numbers = #tpu.dot_dimension_numbers<[1], [0], [0], [1], [0, 0, 1, 1], [], []>} : vector<8x32xbf16>, vector<32x4xbf16>, vector<8x4xf32> -> vector<8x4xf32>
    %c0_10 = arith.constant 0 : index
    %c0_11 = arith.constant 0 : index
    %15 = vector.load %arg5[%c0_10, %c0_11] : memref<1x4xf32, #tpu.memory_space<vmem>>, vector<1x4xf32>
    %16 = vector.broadcast %15 : vector<1x4xf32> to vector<8x4xf32>
    %17 = arith.addf %14, %16 : vector<8x4xf32>
    %c0_12 = arith.constant 0 : index
    %c0_13 = arith.constant 0 : index
    %18 = vector.load %arg6[%c0_12, %c0_13] : memref<8x4xf32, #tpu.memory_space<vmem>>, vector<8x4xf32>
    tpu.vector_store %arg6[%c0_12, %c0_13], %17 {strides = array<i32>} : memref<8x4xf32, #tpu.memory_space<vmem>>, vector<8x4xf32>,
    return
  }
  func.func @transform_0(%arg0: i32) -> (i32, i32) {
    %c0_i32 = arith.constant 0 : i32
    %c0_i32_0 = arith.constant 0 : i32
    return %arg0, %c0_i32 : i32, i32
  }
  func.func @transform_1(%arg0: i32) -> (i32, i32) {
    %c0_i32 = arith.constant 0 : i32
    %c0_i32_0 = arith.constant 0 : i32
    %c0_i32_1 = arith.constant 0 : i32
    return %c0_i32, %c0_i32_0 : i32, i32
  }
  func.func @transform_2(%arg0: i32) -> (i32, i32) {
    %c0_i32 = arith.constant 0 : i32
    %c0_i32_0 = arith.constant 0 : i32
    %c0_i32_1 = arith.constant 0 : i32
    return %c0_i32, %c0_i32_0 : i32, i32
  }
  func.func @transform_3(%arg0: i32) -> (i32, i32) {
    %c0_i32 = arith.constant 0 : i32
    %c0_i32_0 = arith.constant 0 : i32
    %c0_i32_1 = arith.constant 0 : i32
    return %c0_i32, %c0_i32_0 : i32, i32
  }
  func.func @transform_4(%arg0: i32) -> (i32, i32) {
    %c0_i32 = arith.constant 0 : i32
    %c0_i32_0 = arith.constant 0 : i32
    %c0_i32_1 = arith.constant 0 : i32
    return %c0_i32, %c0_i32_0 : i32, i32
  }
  func.func @transform_5(%arg0: i32) -> (i32, i32) {
    %c0_i32 = arith.constant 0 : i32
    %c0_i32_0 = arith.constant 0 : i32
    return %arg0, %c0_i32 : i32, i32
  }
}

</mosaic_0001>

<bundles_post_ra>
// kernel: tpu_custom_call.1
= control target key start
LH: loop header
LB: loop body
LE: loop exit
PB: predicated region body
PF: predicated region fallthrough
CT: control target
= control target key end

     0   :  { %10 = vsyncpa [#allocation3], 0  ;;  %s172_s21 = smov [#allocation2]   ;;  %s227_s0 = inlined_call_operand.hbm [shape: f32[8,32], index: 0, kind: input, shape index: {}]   ;;  %s228_s1 = inlined_call_operand.vmem [shape: bf16[32,32], index: 1, kind: input, shape index: {}]   ;;  %s229_s2 = inlined_call_operand.vmem [shape: f32[1,32], index: 2, kind: input, shape index: {}]   ;;  %s230_s3 = inlined_call_operand.vmem [shape: bf16[32,4], index: 3, kind: input, shape index: {}]   ;;  %s231_s4 = inlined_call_operand.vmem [shape: f32[1,4], index: 4, kind: input, shape index: {}]   ;;  %s232_s5 = inlined_call_operand.vmem [shape: f32[8,4], index: 5, kind: output, shape index: {}]  }
   0x1   :  { %s16_s20 = sshll.u32 %s227_s0, 4  ;;  %s18_s22 = sshll.u32 %s172_s21, 4  ;;  %s17_s20 = int_to_ptr.hbm [resolvable:$true] %s16_s20  ;;  %s19_s22 = int_to_ptr.vmem [resolvable:$true] %s18_s22 }
   0x2   :  { %21 = dma.hbm_to_vmem [thread:$0]  %s17_s20, 128, %s19_s22, [#allocation3]  }
   0x3   :  { %170 = dma.done.wait [#allocation3], 128  }
   0x4   :  { %171 = vsyncadd [#allocation3], 4294967168  ;;  %v140_v0 = vld [vmem:[%s228_s1 + $0x8] sm:$0xff]  ;;  %v139_v1 = vld [vmem:[%s228_s1] sm:$0xff]  ;;  %vm57_vm0 = vcmask 261120   ;;  %vm114_vm2 = vcmask 31744  }
   0x5   :  { %67 = vmatpush.bf16.msra.mxu0 %v140_v0  ;;  %v35_v2 = vld [vmem:[#allocation2] sm:$0xff]  ;;  %v142_v4 = vld [vmem:[%s230_s3 + $0x8] sm:$0xff] }
   0x6   :  { %v36_v3 = vpack.c.bf16 %v35_v2, %v35_v2  ;;  %107 = vmatpush.bf16.msra.mxu1 %v142_v4  ;;  %v141_v5 = vld [vmem:[%s230_s3] sm:$0xff] }
   0x7   :  { %v144_v6 = vld [vmem:[%s229_s2] ss:$0 sm:$0xff] }
   0x8   :  { %v145_v13 = vld [vmem:[%s231_s4] ss:$0 sm:$0xff] }
   0x9   :  { %68 = vmatpush.bf16.msra.mxu0 %v139_v1 }
   0xa   :  { %108 = vmatpush.bf16.msra.mxu1 %v141_v5 }
   0xc   :  { %129 = vmatmul.msk.bf16.vlgmr.msra.gmra.mxu0 %vm57_vm0, %v36_v3 }
  0x89   :  { %v70_v7 = vpop.f32.mrf.mxu0 }
  0x8a   :  { %v71_v8 = vadd.f32 %v144_v6, %v70_v7 }
  0x8c   :  { %vm74_vm1 = vcmp.gt.f32.partialorder %v71_v8, 0.0  ;;  %v75_v9 = vmul.f32 0.01, %v71_v8 }
  0x8e   :  { %v76_v10 = vsel %vm74_vm1, %v71_v8, %v75_v9 }
  0x8f   :  { %v77_v11 = vpack.c.bf16 %v76_v10, %v76_v10 }
  0x91   :  { %v72_v12 = vpop.f32.mrf.mxu0  ;;  %138 = vmatmul.msk.bf16.vlgmr.msra.gmra.mxu1 %vm57_vm0, %v77_v11 }
 0x10e   :  { %v110_v14 = vpop.f32.mrf.mxu1 }
 0x10f   :  { %v111_v15 = vadd.f32 %v145_v13, %v110_v14 }
 0x111   :  { %115 = vst.msk [vmem:[%s232_s5] sm:$0xff] %vm114_vm2, %v111_v15 }
 0x116   :  { %v112_v16 = vpop.f32.mrf.mxu1 }
 0x117   :  { %120 = vsyncpa [#allocation3], 1 }

</bundles_post_ra>
